<compile_context>
chip_gen: v7x
topology: tpu7x:2x2x1
jax: 0.10.0
libtpu: 0.0.40
codegen_flags: <defaults>
</compile_context>

<pallas_src>
import functools

import jax
import jax.numpy as jnp
from jax import lax
from jax.experimental import pallas as pl
from jax.experimental.pallas import tpu as pltpu

# Per-step VMEM budget for the pipelined blocks (patches + out, double-buffered).
# Kept well under the default scoped VMEM limit on v5e/v6e/v7x.
_VMEM_BUDGET_BYTES = 8 << 20


def _resblock_kernel(p_ref, w3_ref, b1_ref, w1_ref, b2_ref, o_ref, *, cin):
    # p_ref : (K, TM)      transposed im2col patches; K = 9*cin, taps ordered
    #                      (dy, dx) row-major with channels innermost, so rows
    #                      [4*cin, 5*cin) are the (pre-relu) center pixel == x.
    # w3_ref: (Cmid, K)    conv3x3 weights matching the patch row ordering.
    # b1_ref: (Cmid, 1)
    # w1_ref: (Cout, Cmid) conv1x1 weights.
    # b2_ref: (Cout, 1)
    # o_ref : (Cout, TM)
    p = p_ref[...]                                # (K, TM)
    x_res = p[4 * cin:5 * cin, :]                 # residual, no extra DMA
    h = jnp.maximum(p, 0.0)                       # relu(x); zero-pad is relu-invariant

    # conv3x3 == one MXU matmul over K = 9*Cin.
    y = jnp.dot(w3_ref[...], h, preferred_element_type=jnp.float32) + b1_ref[...]
    y = jnp.maximum(y, 0.0)                       # second relu

    # conv1x1 == matmul over channels.
    y = jnp.dot(w1_ref[...], y, preferred_element_type=jnp.float32) + b2_ref[...]

    o_ref[...] = x_res + y                        # lane-dense (Cout, TM) store


def _resblock_pallas_impl(x_nchw, w3_oihw, b1, w1_oihw, b2):
    """x_nchw: (N, C, H, W) float32. Weights in PyTorch OIHW layout."""
    N, Cin, H, W = x_nchw.shape
    Cmid = w3_oihw.shape[0]
    Cout = w1_oihw.shape[0]
    assert Cin == Cout, "residual add requires in_channels == out_channels"

    K = 9 * Cin
    M = N * H * W

    # ---- wrapper glue: build patches directly in (K, M) layout ----
    x_c = jnp.transpose(x_nchw, (1, 0, 2, 3)).astype(jnp.float32)      # (C, N, H, W)
    xp = jnp.pad(x_c, ((0, 0), (0, 0), (1, 1), (1, 1)))                # (C, N, H+2, W+2)
    taps = [xp[:, :, dy:dy + H, dx:dx + W].reshape(Cin, M)
            for dy in range(3) for dx in range(3)]
    patches_t = jnp.concatenate(taps, axis=0)                          # (K, M)

    # Lane tile: multiple of 128, as large as the VMEM budget allows.
    m_128 = ((M + 127) // 128) * 128
    tm_budget = (_VMEM_BUDGET_BYTES // (8 * (K + Cout))) // 128 * 128  # 2x dbl-buf, f32
    TM = min(max(128, tm_budget), m_128)
    M_pad = ((M + TM - 1) // TM) * TM
    if M_pad != M:
        patches_t = jnp.pad(patches_t, ((0, 0), (0, M_pad - M)))

    # Weights in kernel-friendly 2-D layouts (K ordering matches the patches).
    w3k = jnp.transpose(w3_oihw, (0, 2, 3, 1)).reshape(Cmid, K).astype(jnp.float32)
    w1k = w1_oihw[:, :, 0, 0].astype(jnp.float32)                      # (Cout, Cmid)
    b1c = b1.reshape(Cmid, 1).astype(jnp.float32)
    b2c = b2.reshape(Cout, 1).astype(jnp.float32)

    grid = (M_pad // TM,)
    out_t = pl.pallas_call(
        functools.partial(_resblock_kernel, cin=Cin),
        out_shape=jax.ShapeDtypeStruct((Cout, M_pad), jnp.float32),
        grid=grid,
        in_specs=[
            pl.BlockSpec((K, TM), lambda i: (0, i)),          # patches (tiled over M)
            pl.BlockSpec((Cmid, K), lambda i: (0, 0)),        # w3 (resident)
            pl.BlockSpec((Cmid, 1), lambda i: (0, 0)),        # b1
            pl.BlockSpec((Cout, Cmid), lambda i: (0, 0)),     # w1
            pl.BlockSpec((Cout, 1), lambda i: (0, 0)),        # b2
        ],
        out_specs=pl.BlockSpec((Cout, TM), lambda i: (0, i)),
        compiler_params=pltpu.CompilerParams(
            dimension_semantics=("parallel",)),
    )(patches_t, w3k, b1c, w1k, b2c)

    # Back to NCHW.
    out = out_t[:, :M].reshape(Cout, N, H, W)
    return jnp.transpose(out, (1, 0, 2, 3))


resblock_pallas = jax.jit(_resblock_pallas_impl)


def _resblock_ref(x_nchw, w3_oihw, b1, w1_oihw, b2):
    """Pure-JAX reference (mirrors the PyTorch module) for a sanity check."""
    h = jnp.maximum(x_nchw, 0.0)
    y = lax.conv_general_dilated(h, w3_oihw, (1, 1), ((1, 1), (1, 1)),
                                 dimension_numbers=("NCHW", "OIHW", "NCHW"))
    y = y + b1.reshape(1, -1, 1, 1)
    y = jnp.maximum(y, 0.0)
    y = lax.conv_general_dilated(y, w1_oihw, (1, 1), ((0, 0), (0, 0)),
                                 dimension_numbers=("NCHW", "OIHW", "NCHW"))
    y = y + b2.reshape(1, -1, 1, 1)
    return x_nchw + y


if __name__ == "__main__":
    # Small shapes consistent with ResBlock(in_channels=4, out_channels=4).
    N, C, H, W = 2, 4, 16, 16
    Cmid, Cout = C, C  # mid_channels defaults to out_channels; residual needs Cout==Cin

    key = jax.random.PRNGKey(0)
    k_x, k_w3, k_b1, k_w1, k_b2 = jax.random.split(key, 5)

    x = jax.random.normal(k_x, (N, C, H, W), dtype=jnp.float32)
    # Deterministic synthetic parameters (PyTorch Conv2d weight layout: OIHW).
    w3 = jax.random.normal(k_w3, (Cmid, C, 3, 3), dtype=jnp.float32) * 0.1
    b1 = jax.random.normal(k_b1, (Cmid,), dtype=jnp.float32) * 0.1
    w1 = jax.random.normal(k_w1, (Cout, Cmid, 1, 1), dtype=jnp.float32) * 0.1
    b2 = jax.random.normal(k_b2, (Cout,), dtype=jnp.float32) * 0.1

    out = resblock_pallas(x, w3, b1, w1, b2)
    out = jax.block_until_ready(out)

    ref = jax.block_until_ready(_resblock_ref(x, w3, b1, w1, b2))
    assert out.shape == (N, Cout, H, W)
    assert jnp.allclose(out, ref, atol=1e-4, rtol=1e-4), "mismatch vs reference"

    print("KERNEL_OK")
</pallas_src>

<mosaic_0001>
module attributes {stable_mosaic.version = 11 : i64} {
  func.func @_resblock_kernel(%arg0: i32, %arg1: memref<36x512xf32, #tpu.memory_space<vmem>>, %arg2: memref<4x36xf32, #tpu.memory_space<vmem>>, %arg3: memref<4x1xf32, #tpu.memory_space<vmem>>, %arg4: memref<4x4xf32, #tpu.memory_space<vmem>>, %arg5: memref<4x1xf32, #tpu.memory_space<vmem>>, %arg6: memref<4x512xf32, #tpu.memory_space<vmem>>) attributes {dimension_semantics = [#tpu.dimension_semantics<parallel>], iteration_bounds = array<i64: 1>, scalar_prefetch = 0 : i64, scratch_operands = 0 : i64, tpu.core_type = #tpu.core_type<tc>, window_params = [{transform_indices = @transform_0, window_bounds = array<i64: 36, 512>}, {pipeline_mode = #tpu.pipeline_mode<synchronous>, transform_indices = @transform_1, window_bounds = array<i64: 4, 36>}, {pipeline_mode = #tpu.pipeline_mode<synchronous>, transform_indices = @transform_2, window_bounds = array<i64: 4, 1>}, {pipeline_mode = #tpu.pipeline_mode<synchronous>, transform_indices = @transform_3, window_bounds = array<i64: 4, 4>}, {pipeline_mode = #tpu.pipeline_mode<synchronous>, transform_indices = @transform_4, window_bounds = array<i64: 4, 1>}, {transform_indices = @transform_5, window_bounds = array<i64: 4, 512>}]} {
    %c0 = arith.constant 0 : index
    %c0_0 = arith.constant 0 : index
    %0 = vector.load %arg1[%c0, %c0_0] : memref<36x512xf32, #tpu.memory_space<vmem>>, vector<36x512xf32>
    %1 = vector.extract_strided_slice %0 {offsets = [16, 0], sizes = [4, 512], strides = [1, 1]} : vector<36x512xf32> to vector<4x512xf32>
    %cst = arith.constant 0.000000e+00 : f32
    %2 = vector.broadcast %cst : f32 to vector<36x512xf32>
    %3 = arith.maximumf %0, %2 : vector<36x512xf32>
    %c0_1 = arith.constant 0 : index
    %c0_2 = arith.constant 0 : index
    %4 = vector.load %arg2[%c0_1, %c0_2] : memref<4x36xf32, #tpu.memory_space<vmem>>, vector<4x36xf32>
    %cst_3 = arith.constant dense<0.000000e+00> : vector<4x512xf32>
    %5 = tpu.matmul %4, %3, %cst_3 {dimension_numbers = #tpu.dot_dimension_numbers<[1], [0], [0], [1], [0, 0, 1, 1], [], []>} : vector<4x36xf32>, vector<36x512xf32>, vector<4x512xf32> -> vector<4x512xf32>
    %c0_4 = arith.constant 0 : index
    %c0_5 = arith.constant 0 : index
    %6 = vector.load %arg3[%c0_4, %c0_5] : memref<4x1xf32, #tpu.memory_space<vmem>>, vector<4x1xf32>
    %7 = vector.broadcast %6 : vector<4x1xf32> to vector<4x512xf32>
    %8 = arith.addf %5, %7 : vector<4x512xf32>
    %cst_6 = arith.constant 0.000000e+00 : f32
    %9 = vector.broadcast %cst_6 : f32 to vector<4x512xf32>
    %10 = arith.maximumf %8, %9 : vector<4x512xf32>
    %c0_7 = arith.constant 0 : index
    %c0_8 = arith.constant 0 : index
    %11 = vector.load %arg4[%c0_7, %c0_8] : memref<4x4xf32, #tpu.memory_space<vmem>>, vector<4x4xf32>
    %cst_9 = arith.constant dense<0.000000e+00> : vector<4x512xf32>
    %12 = tpu.matmul %11, %10, %cst_9 {dimension_numbers = #tpu.dot_dimension_numbers<[1], [0], [0], [1], [0, 0, 1, 1], [], []>} : vector<4x4xf32>, vector<4x512xf32>, vector<4x512xf32> -> vector<4x512xf32>
    %c0_10 = arith.constant 0 : index
    %c0_11 = arith.constant 0 : index
    %13 = vector.load %arg5[%c0_10, %c0_11] : memref<4x1xf32, #tpu.memory_space<vmem>>, vector<4x1xf32>
    %14 = vector.broadcast %13 : vector<4x1xf32> to vector<4x512xf32>
    %15 = arith.addf %12, %14 : vector<4x512xf32>
    %16 = arith.addf %1, %15 : vector<4x512xf32>
    %c0_12 = arith.constant 0 : index
    %c0_13 = arith.constant 0 : index
    %17 = vector.load %arg6[%c0_12, %c0_13] : memref<4x512xf32, #tpu.memory_space<vmem>>, vector<4x512xf32>
    tpu.vector_store %arg6[%c0_12, %c0_13], %16 {strides = array<i32>} : memref<4x512xf32, #tpu.memory_space<vmem>>, vector<4x512xf32>,
    return
  }
  func.func @transform_0(%arg0: i32) -> (i32, i32) {
    %c0_i32 = arith.constant 0 : i32
    %c0_i32_0 = arith.constant 0 : i32
    return %c0_i32, %arg0 : i32, i32
  }
  func.func @transform_1(%arg0: i32) -> (i32, i32) {
    %c0_i32 = arith.constant 0 : i32
    %c0_i32_0 = arith.constant 0 : i32
    %c0_i32_1 = arith.constant 0 : i32
    return %c0_i32, %c0_i32_0 : i32, i32
  }
  func.func @transform_2(%arg0: i32) -> (i32, i32) {
    %c0_i32 = arith.constant 0 : i32
    %c0_i32_0 = arith.constant 0 : i32
    %c0_i32_1 = arith.constant 0 : i32
    return %c0_i32, %c0_i32_0 : i32, i32
  }
  func.func @transform_3(%arg0: i32) -> (i32, i32) {
    %c0_i32 = arith.constant 0 : i32
    %c0_i32_0 = arith.constant 0 : i32
    %c0_i32_1 = arith.constant 0 : i32
    return %c0_i32, %c0_i32_0 : i32, i32
  }
  func.func @transform_4(%arg0: i32) -> (i32, i32) {
    %c0_i32 = arith.constant 0 : i32
    %c0_i32_0 = arith.constant 0 : i32
    %c0_i32_1 = arith.constant 0 : i32
    return %c0_i32, %c0_i32_0 : i32, i32
  }
  func.func @transform_5(%arg0: i32) -> (i32, i32) {
    %c0_i32 = arith.constant 0 : i32
    %c0_i32_0 = arith.constant 0 : i32
    return %c0_i32, %arg0 : i32, i32
  }
}

</mosaic_0001>

<bundles_post_ra>
// kernel: _resblock_pallas_impl.1
= control target key start
LH: loop header
LB: loop body
LE: loop exit
PB: predicated region body
PF: predicated region fallthrough
CT: control target
= control target key end

     0   :  { %v444_v3 = vmov 0.0   ;;  %v445_v10 = vmov 0   ;;  %vm71_vm0 = vcmask 1043456   ;;  %vm67_vm1 = vcmask 293888   ;;  %s582_s0 = inlined_call_operand.vmem [shape: f32[36,512], index: 0, kind: input, shape index: {}]   ;;  %s583_s2 = inlined_call_operand.vmem [shape: f32[4,1], index: 2, kind: input, shape index: {}]   ;;  %s584_s4 = inlined_call_operand.vmem [shape: f32[4,1], index: 4, kind: input, shape index: {}]   ;;  %s585_s1 = inlined_call_operand.vmem [shape: f32[4,36], index: 1, kind: input, shape index: {}]   ;;  %s586_s3 = inlined_call_operand.vmem [shape: f32[4,4], index: 3, kind: input, shape index: {}]   ;;  %s587_s5 = inlined_call_operand.vmem [shape: f32[4,512], index: 5, kind: output, shape index: {}]  }
   0x1   :  { %v21_v0 = vld [vmem:[%s582_s0 + $0x8] sm:$0xff]  ;;  %v23_v2 = vld [vmem:[%s582_s0 + $0x18] sm:$0xff]  ;;  %148 = vmatprep.mubr.f32.mxu0 %v444_v3  ;;  %219 = vmatprep.mubr.f32.mxu1 %v444_v3  ;;  %v20_v8 = vld [vmem:[%s582_s0] sm:$0xff]  ;;  %vm237_vm2 = vcmask 31744  }
   0x2   :  { %v25_v1 = vld [vmem:[%s582_s0 + $0x28] sm:$0xff]  ;;  %v41_v4 = vmax.f32 %v21_v0, 0.0  ;;  %v27_v6 = vld [vmem:[%s582_s0 + $0x38] sm:$0xff]  ;;  %v43_v7 = vmax.f32 %v23_v2, 0.0  ;;  %v24_v9 = vld [vmem:[%s582_s0 + $0x20] sm:$0xff]  ;;  %443 = vset.pattern.permute.xlu0 %v445_v10  ;;  %v40_v12 = vmax.f32 %v20_v8, 0.0 }
   0x3   :  { %v45_v5 = vmax.f32 %v25_v1, 0.0  ;;  %v47_v11 = vmax.f32 %v27_v6, 0.0  ;;  %v44_v13 = vmax.f32 %v24_v9, 0.0  ;;  %v22_v14 = vld [vmem:[%s582_s0 + $0x10] sm:$0xff]  ;;  %v505_v16 = vld [vmem:[%s582_s0 + $0x48] sm:$0xff]  ;;  %v514_v22 = vld [vmem:[%s582_s0 + $0x58] sm:$0xff] }
   0x4   :  { %v26_v15 = vld [vmem:[%s582_s0 + $0x30] sm:$0xff]  ;;  %v42_v18 = vmax.f32 %v22_v14, 0.0  ;;  %v33_v20 = vld [vmem:[%s582_s0 + $0x68] sm:$0xff]  ;;  %v49_v21 = vmax.f32 %v505_v16, 0.0  ;;  %v35_v23 = vld [vmem:[%s582_s0 + $0x78] sm:$0xff]  ;;  %v51_v27 = vmax.f32 %v514_v22, 0.0 }
   0x5   :  { %v425_v17 = vpack.c.bf16 %v45_v5, %v41_v4  ;;  %v46_v19 = vmax.f32 %v26_v15, 0.0  ;;  %v433_v24 = vpack.c.bf16 %v47_v11, %v43_v7  ;;  %v427_v25 = vpack.c.bf16 %v44_v13, %v40_v12  ;;  %v523_v28 = vld [vmem:[%s582_s0 + $0x40] sm:$0xff]  ;;  %v531_v30 = vld [vmem:[%s582_s0 + $0x50] sm:$0xff]  ;;  %v37_v36 = vld [vmem:[%s582_s0 + $0x88] sm:$0xf] }
   0x6   :  { %v53_v26 = vmax.f32 %v33_v20, 0.0  ;;  %v32_v29 = vld [vmem:[%s582_s0 + $0x60] sm:$0xff]  ;;  %v55_v32 = vmax.f32 %v35_v23, 0.0  ;;  %v48_v33 = vmax.f32 %v523_v28, 0.0  ;;  %v34_v35 = vld [vmem:[%s582_s0 + $0x70] sm:$0xff]  ;;  %v50_v38 = vmax.f32 %v531_v30, 0.0 }
   0x7   :  { %426 = vmatprep.subr.bf16.mxu0 %v425_v17  ;;  %v435_v31 = vpack.c.bf16 %v46_v19, %v42_v18  ;;  %v52_v34 = vmax.f32 %v32_v29, 0.0  ;;  %434 = vmatprep.subr.bf16.mxu1 %v433_v24  ;;  %v54_v39 = vmax.f32 %v34_v35, 0.0  ;;  %v39_v40 = vld [vmem:[%s582_s0 + $0x98] sm:$0xf]  ;;  %v57_v43 = vmax.f32 %v37_v36, 0.0 }
   0x8   :  { %428 = vmatpush1.bf16.msra.mxu0 %v427_v25  ;;  %v429_v37 = vpack.c.bf16 %v53_v26, %v49_v21  ;;  %v437_v41 = vpack.c.bf16 %v55_v32, %v51_v27  ;;  %v36_v44 = vld [vmem:[%s582_s0 + $0x80] sm:$0xf]  ;;  %v59_v46 = vmax.f32 %v39_v40, 0.0  ;;  %v38_v47 = vld [vmem:[%s582_s0 + $0x90] sm:$0xf] }
   0x9   :  { %436 = vmatpush1.bf16.msra.mxu1 %v435_v31  ;;  %v431_v42 = vpack.c.bf16 %v52_v34, %v48_v33  ;;  %v439_v45 = vpack.c.bf16 %v54_v39, %v50_v38  ;;  %v61_v48 = vld [vmem:[%s583_s2] sm:$0xf]  ;;  %v56_v49 = vmax.f32 %v36_v44, 0.0  ;;  %v58_v51 = vmax.f32 %v38_v47, 0.0 }
   0xa   :  { %430 = vmatprep.subr.bf16.mxu0 %v429_v37  ;;  %438 = vmatprep.subr.bf16.mxu1 %v437_v41  ;;  %v231_v50 = vld [vmem:[%s584_s4] sm:$0xf] }
   0xb   :  { %64 = vperm.xlu0 %443, %v61_v48   ;;  %v60_v52 = vld [vmem:[%s585_s1] sm:$0xf] }
   0xc   :  { %432 = vmatpush1.bf16.msra.mxu0 %v431_v42  ;;  %v230_v1 = vld [vmem:[%s586_s3] sm:$0xf] }
   0xd   :  { %440 = vmatpush1.bf16.msra.mxu1 %v439_v45  ;;  %413 = vmatprep.subr.msk.mxu0 %vm71_vm0, %v57_v43 }
   0xe   :  { %416 = vmatprep.subr.msk.mxu1 %vm71_vm0, %v59_v46 }
   0xf   :  { %234 = vperm.xlu0 %443, %v231_v50  }
  0x10   :  { %414 = vmatpush1.msk.msra.mxu0 %vm71_vm0, %v56_v49 }
  0x11   :  { %417 = vmatpush1.msk.msra.mxu1 %vm71_vm0, %v58_v51  ;;  %415 = vmatmul.mubr.msk.f32.vlgmr.msra.gmra.mrb[0].mxu0 %vm67_vm1, %v60_v52 }
  0x12   :  { %418 = vmatmul.mubr.msk.f32.vlgmr.msra.gmra.mrb[0].mxu1 %vm67_vm1, %v60_v52  ;;  %317 = vmatprep.mubr.f32.mxu0 %v444_v3 }
  0x13   :  { %388 = vmatprep.mubr.f32.mxu1 %v444_v3 }
  0x8a   :  { %v65_v53 = vpop.permute.xlu0 %64 }
  0x8e   :  { %v235_v3 = vpop.permute.xlu0 %234 }
  0xe4   :  { %v150_v54 = vpop.f32.mrb[0].mxu0 }
  0xe5   :  { %v151_v55 = vadd.f32 %v150_v54, %v65_v53  ;;  %v221_v56 = vpop.f32.mrb[0].mxu1  ;;  %v152_v57 = vpop.f32.mrb[1].mxu0 }
  0xe6   :  { %v222_v58 = vadd.f32 %v221_v56, %v65_v53  ;;  %v153_v59 = vadd.f32 %v152_v57, %v65_v53  ;;  %v223_v60 = vpop.f32.mrb[1].mxu1 }
  0xe7   :  { %v224_v61 = vadd.f32 %v223_v60, %v65_v53  ;;  %v226_v63 = vmax.f32 %v151_v55, 0.0 }
  0xe8   :  { %v227_v62 = vmax.f32 %v153_v59, 0.0  ;;  %v228_v2 = vmax.f32 %v222_v58, 0.0 }
  0xe9   :  { %v229_v0 = vmax.f32 %v224_v61, 0.0 }
  0xea   :  { %419 = vmatprep.subr.msk.mxu0 %vm71_vm0, %v227_v62 }
  0xeb   :  { %422 = vmatprep.subr.msk.mxu1 %vm71_vm0, %v229_v0  ;;  %420 = vmatpush1.msk.msra.mxu0 %vm71_vm0, %v226_v63 }
  0xec   :  { %423 = vmatpush1.msk.msra.mxu1 %vm71_vm0, %v228_v2  ;;  %421 = vmatmul.mubr.msk.f32.vlgmr.msra.gmra.mrb[2].mxu0 %vm237_vm2, %v230_v1 }
  0xed   :  { %424 = vmatmul.mubr.msk.f32.vlgmr.msra.gmra.mrb[2].mxu1 %vm237_vm2, %v230_v1 }
 0x1bf   :  { %v319_v4 = vpop.f32.mrb[2].mxu0 }
 0x1c0   :  { %v320_v5 = vadd.f32 %v319_v4, %v235_v3  ;;  %v390_v6 = vpop.f32.mrb[2].mxu1  ;;  %v321_v7 = vpop.f32.mrb[3].mxu0 }
 0x1c1   :  { %v391_v8 = vadd.f32 %v390_v6, %v235_v3  ;;  %v322_v9 = vadd.f32 %v321_v7, %v235_v3  ;;  %v392_v10 = vpop.f32.mrb[3].mxu1 }
 0x1c2   :  { %v395_v11 = vadd.f32 %v320_v5, %v523_v28  ;;  %v393_v12 = vadd.f32 %v392_v10, %v235_v3 }
 0x1c3   :  { %v397_v13 = vadd.f32 %v391_v8, %v531_v30  ;;  %v396_v14 = vadd.f32 %v322_v9, %v505_v16 }
 0x1c4   :  { %v398_v15 = vadd.f32 %v393_v12, %v514_v22 }
 0x1c5   :  { %v403_v17 = vcombine.low %v395_v11, %v396_v14 }
 0x1c6   :  { %v404_v18 = vcombine.low %v397_v13, %v398_v15 }
 0x1c7   :  { %407 = vst [vmem:[%s587_s5] sm:$0xff] %v403_v17 }
 0x1c8   :  { %408 = vst [vmem:[%s587_s5 + $0x8] sm:$0xff] %v404_v18 }

</bundles_post_ra>
